<compile_context>
chip_gen: v7x
topology: tpu7x:2x2x1
jax: 0.10.0
libtpu: 0.0.40
codegen_flags: <defaults>
</compile_context>

<pallas_src>
import jax
import jax.numpy as jnp
from jax.experimental import pallas as pl
from jax.experimental.pallas import tpu as pltpu


def make_tcn_kernel(num_layers, dilations, Tp, TB):
    """Kernel closure for a fixed layer stack / trimmed length / batch tile.

    Row layout inside a block: row r = t*TB + b_local, t in [0, Tp),
    b_local in [0, TB).  Only the t == 0 rows of the final conv layer are
    read; rows whose taps wrap around the block hold finite garbage for the
    SAME batch element and never feed a row that is read (the t == 0 read
    cone ends at t == rf == Tp - 1).
    """
    M = TB * Tp

    def kernel(*refs):
        x_ref = refs[0]                 # (M, Cin)  f32, time-major rows
        o_ref = refs[-1]                # (TB, O)   f32
        p = refs[1:-1]                  # w0_i, w1_i, b_i, ..., lin_w, lin_b

        h = x_ref[...].astype(jnp.float32)                    # (M, Cin)
        for i in range(num_layers):
            w0 = p[3 * i][...]          # (Cin_i, Cout_i) bf16, tap at t
            w1 = p[3 * i + 1][...]      # (Cin_i, Cout_i) bf16, tap at t + d
            b = p[3 * i + 2][...]       # (1, Cout_i)     f32
            step = dilations[i] * TB
            # shifted[r] = h[(r + step) % M]; step is a multiple of TB so a
            # wrap stays inside the same batch element (invalid time only).
            shifted = pltpu.roll(h, M - step, axis=0)          # XLU sublane roll
            acc = jnp.dot(h.astype(jnp.bfloat16), w0,
                          preferred_element_type=jnp.float32)
            acc += jnp.dot(shifted.astype(jnp.bfloat16), w1,
                           preferred_element_type=jnp.float32)
            h = jnp.maximum(acc + b, 0.0)                      # bias+ReLU, f32

        wl, bl = p[-2][...], p[-1][...]          # (C_last, O) bf16, (1, O) f32
        last = h[:TB, :]                # t == 0 rows == final valid timestep
        out = jnp.dot(last.astype(jnp.bfloat16), wl,
                      preferred_element_type=jnp.float32) + bl
        o_ref[...] = out                                       # (TB, O)

    return kernel


def _vmem_capacity_bytes():
    try:
        return int(pltpu.get_tpu_info().vmem_capacity_bytes)
    except Exception:
        return 64 << 20     # conservative default (v7x per-TensorCore VMEM)


def _pick_batch_tile(B, Tp, c_max):
    """Batch elements per grid step, sized from VMEM (~25% of capacity for the
    live slabs; Pallas double-buffers the input block on top).  Multi-step
    tiles keep TB % 8 == 0 so the (TB*Tp, C) input block and the (TB, O)
    output block satisfy the (8, 128) sublane rule."""
    budget = _vmem_capacity_bytes() // 4
    per_b = Tp * max(c_max, 128) * 4 * 6   # x + h + shifted + acc (+buffering), lane-padded
    cap = max(1, budget // per_b)
    if B <= cap:
        # Prefer >=2 grid steps for large batches: a 1-step grid runs on a
        # single TensorCore and idles half a v7x chip.
        if B >= 32 and B % 16 == 0:
            return B // 2
        return B
    cands = [tb for tb in range(8, B, 8) if B % tb == 0 and tb <= cap]
    if cands:
        return max(cands)
    # Nothing 8-aligned fits the nominal budget: take the smallest 8-aligned
    # divisor (minimum VMEM) instead of silently using the whole batch.
    cands = [tb for tb in range(8, B, 8) if B % tb == 0]
    return min(cands) if cands else B


def tcn_forward(x, conv_weights, conv_biases, lin_w, lin_b):
    """x: (B, T, input_size) float32.  Returns squeeze((B, output_size))."""
    B, T, Cin = x.shape
    num_layers = len(conv_weights)
    dilations = [2 ** i for i in range(num_layers)]
    rf = sum(dilations)                 # total receptive-field shrink
    Tp = rf + 1                         # timesteps that actually feed the output
    assert T >= Tp, "sequence too short for the dilated stack"
    # Hard guarantee behind the roll-wrap safety argument: the single read row
    # (t == 0 of the final layer) has its receptive cone fully inside Tp steps.
    assert 0 + rf <= Tp - 1
    O = lin_w.shape[1]
    c_max = max([Cin] + [w.shape[2] for w in conv_weights])

    TB = _pick_batch_tile(B, Tp, c_max)
    assert B % TB == 0
    n_tiles = B // TB
    M = TB * Tp

    # Only the last rf+1 timesteps matter; slice them out, then lay rows out
    # time-major *within each batch tile* (row = t*TB + b_local) so the
    # in-kernel shift is a pure roll and the final gather is rows [0, TB).
    x_last = x[:, T - Tp:, :]                                   # (B, Tp, Cin)
    x_tm = (x_last.reshape(n_tiles, TB, Tp, Cin)
            .transpose(0, 2, 1, 3)                              # (tiles, Tp, TB, Cin)
            .reshape(n_tiles * M, Cin))

    x_spec_kwargs = {}
    if n_tiles > 1:
        # v5e: small per-step blocks leave DMA latency exposed; buffer deeper.
        x_spec_kwargs = dict(pipeline_mode=pl.Buffered(3))
    in_specs = [pl.BlockSpec((M, Cin), lambda i: (i, 0), **x_spec_kwargs)]
    args = [x_tm]
    for w, bvec in zip(conv_weights, conv_biases):
        w0 = w[0].astype(jnp.bfloat16)   # (Cin_i, Cout_i), tap at t
        w1 = w[1].astype(jnp.bfloat16)   # (Cin_i, Cout_i), tap at t + d
        for arr in (w0, w1, bvec):       # weights stay resident in VMEM
            in_specs.append(pl.BlockSpec(arr.shape, lambda i: (0, 0)))
        args += [w0, w1, bvec]
    lin_wb = lin_w.astype(jnp.bfloat16)
    in_specs.append(pl.BlockSpec(lin_wb.shape, lambda i: (0, 0)))
    in_specs.append(pl.BlockSpec(lin_b.shape, lambda i: (0, 0)))
    args += [lin_wb, lin_b]

    vmem_cap = _vmem_capacity_bytes()
    out = pl.pallas_call(
        make_tcn_kernel(num_layers, dilations, Tp, TB),
        out_shape=jax.ShapeDtypeStruct((B, O), jnp.float32),
        grid=(n_tiles,),
        in_specs=in_specs,
        out_specs=pl.BlockSpec((TB, O), lambda i: (i, 0)),
        compiler_params=pltpu.CompilerParams(
            dimension_semantics=("parallel",),
            vmem_limit_bytes=int(vmem_cap * 3 // 4)),
    )(*args)

    return jnp.squeeze(out)


def tcn_reference(x, conv_weights, conv_biases, lin_w, lin_b,
                  mxu_dtype=jnp.float32):
    """Pure-JAX reference mirroring the PyTorch forward.  `mxu_dtype=bfloat16`
    reproduces the kernel's matmul-input precision (f32 accumulation,
    f32 bias/ReLU) so the comparison is apples-to-apples."""
    dilations = [2 ** i for i in range(len(conv_weights))]
    h = x                                 # (B, T, C)
    for w, bvec, d in zip(conv_weights, conv_biases, dilations):
        t_out = h.shape[1] - d
        h = (jnp.einsum('btc,co->bto', h[:, :t_out].astype(mxu_dtype),
                        w[0].astype(mxu_dtype),
                        preferred_element_type=jnp.float32)
             + jnp.einsum('btc,co->bto', h[:, d:].astype(mxu_dtype),
                          w[1].astype(mxu_dtype),
                          preferred_element_type=jnp.float32)
             + bvec[None])
        h = jnp.maximum(h, 0.0)
    last = h[:, -1, :]
    out = jnp.dot(last.astype(mxu_dtype), lin_w.astype(mxu_dtype),
                  preferred_element_type=jnp.float32) + lin_b
    return jnp.squeeze(out)


def init_params(key, input_size, num_channels, output_size):
    """Deterministic synthetic parameters (shapes match the nn.Module)."""
    conv_weights, conv_biases = [], []
    c_in = input_size
    for c_out in num_channels:
        key, k1, k2 = jax.random.split(key, 3)
        # PyTorch Conv1d weight is (out, in, k); we store as (k, in, out).
        w = jax.random.normal(k1, (2, c_in, c_out), jnp.float32) * 0.2
        b = jax.random.normal(k2, (1, c_out), jnp.float32) * 0.1
        conv_weights.append(w)
        conv_biases.append(b)
        c_in = c_out
    key, k1, k2 = jax.random.split(key, 3)
    # PyTorch Linear weight is (out, in); we store the transpose (in, out).
    lin_w = jax.random.normal(k1, (num_channels[-1], output_size),
                              jnp.float32) * 0.2
    lin_b = jax.random.normal(k2, (1, output_size), jnp.float32) * 0.1
    return conv_weights, conv_biases, lin_w, lin_b


if __name__ == "__main__":
    # Model config: TCN(input_size=8, output_size=4, num_channels=[16, 16],
    #                  kernel_size=2, dropout=0.2), eval mode.
    B, T = 2, 16
    input_size, output_size = 8, 4
    num_channels = [16, 16]

    key = jax.random.PRNGKey(0)
    key, kx = jax.random.split(key)
    x = jax.random.normal(kx, (B, T, input_size), jnp.float32)

    conv_weights, conv_biases, lin_w, lin_b = init_params(
        key, input_size, num_channels, output_size)

    out = jax.block_until_ready(
        tcn_forward(x, conv_weights, conv_biases, lin_w, lin_b))

    # Matched-precision reference (bf16 MXU inputs, f32 accumulation):
    # identical math to the kernel up to accumulation order.
    ref = jax.block_until_ready(
        tcn_reference(x, conv_weights, conv_biases, lin_w, lin_b,
                      mxu_dtype=jnp.bfloat16))
    # Full-f32 reference (faithful to the PyTorch module) for a sanity bound.
    ref_f32 = jax.block_until_ready(
        tcn_reference(x, conv_weights, conv_biases, lin_w, lin_b))

    assert out.shape == (B, output_size), out.shape
    assert jnp.allclose(out, ref, atol=2e-3, rtol=2e-3), (out, ref)
    assert jnp.allclose(out, ref_f32, atol=1e-1, rtol=1e-1), (out, ref_f32)
    print("KERNEL_OK")
</pallas_src>

<mosaic_0001>
module attributes {stable_mosaic.version = 11 : i64} {
  func.func @kernel(%arg0: i32, %arg1: memref<8x8xf32, #tpu.memory_space<vmem>>, %arg2: memref<8x16xbf16, #tpu.memory_space<vmem>>, %arg3: memref<8x16xbf16, #tpu.memory_space<vmem>>, %arg4: memref<1x16xf32, #tpu.memory_space<vmem>>, %arg5: memref<16x16xbf16, #tpu.memory_space<vmem>>, %arg6: memref<16x16xbf16, #tpu.memory_space<vmem>>, %arg7: memref<1x16xf32, #tpu.memory_space<vmem>>, %arg8: memref<16x4xbf16, #tpu.memory_space<vmem>>, %arg9: memref<1x4xf32, #tpu.memory_space<vmem>>, %arg10: memref<2x4xf32, #tpu.memory_space<vmem>>) attributes {dimension_semantics = [#tpu.dimension_semantics<parallel>], iteration_bounds = array<i64: 1>, scalar_prefetch = 0 : i64, scratch_operands = 0 : i64, tpu.core_type = #tpu.core_type<tc>, window_params = [{transform_indices = @transform_0, window_bounds = array<i64: 8, 8>}, {pipeline_mode = #tpu.pipeline_mode<synchronous>, transform_indices = @transform_1, window_bounds = array<i64: 8, 16>}, {pipeline_mode = #tpu.pipeline_mode<synchronous>, transform_indices = @transform_2, window_bounds = array<i64: 8, 16>}, {pipeline_mode = #tpu.pipeline_mode<synchronous>, transform_indices = @transform_3, window_bounds = array<i64: 1, 16>}, {pipeline_mode = #tpu.pipeline_mode<synchronous>, transform_indices = @transform_4, window_bounds = array<i64: 16, 16>}, {pipeline_mode = #tpu.pipeline_mode<synchronous>, transform_indices = @transform_5, window_bounds = array<i64: 16, 16>}, {pipeline_mode = #tpu.pipeline_mode<synchronous>, transform_indices = @transform_6, window_bounds = array<i64: 1, 16>}, {pipeline_mode = #tpu.pipeline_mode<synchronous>, transform_indices = @transform_7, window_bounds = array<i64: 16, 4>}, {pipeline_mode = #tpu.pipeline_mode<synchronous>, transform_indices = @transform_8, window_bounds = array<i64: 1, 4>}, {transform_indices = @transform_9, window_bounds = array<i64: 2, 4>}]} {
    %c0 = arith.constant 0 : index
    %c0_0 = arith.constant 0 : index
    %0 = vector.load %arg1[%c0, %c0_0] : memref<8x8xf32, #tpu.memory_space<vmem>>, vector<8x8xf32>
    %c0_1 = arith.constant 0 : index
    %c0_2 = arith.constant 0 : index
    %1 = vector.load %arg2[%c0_1, %c0_2] : memref<8x16xbf16, #tpu.memory_space<vmem>>, vector<8x16xbf16>
    %c0_3 = arith.constant 0 : index
    %c0_4 = arith.constant 0 : index
    %2 = vector.load %arg3[%c0_3, %c0_4] : memref<8x16xbf16, #tpu.memory_space<vmem>>, vector<8x16xbf16>
    %c0_5 = arith.constant 0 : index
    %c0_6 = arith.constant 0 : index
    %3 = vector.load %arg4[%c0_5, %c0_6] : memref<1x16xf32, #tpu.memory_space<vmem>>, vector<1x16xf32>
    %c6_i32 = arith.constant 6 : i32
    %4 = tpu.dynamic_rotate %0 by %c6_i32 dim 0 : vector<8x8xf32>, i32 -> vector<8x8xf32>
    %5 = arith.truncf %0 : vector<8x8xf32> to vector<8x8xbf16>
    %cst = arith.constant dense<0.000000e+00> : vector<8x16xf32>
    %6 = tpu.matmul %5, %1, %cst {dimension_numbers = #tpu.dot_dimension_numbers<[1], [0], [0], [1], [0, 0, 1, 1], [], []>} : vector<8x8xbf16>, vector<8x16xbf16>, vector<8x16xf32> -> vector<8x16xf32>
    %7 = arith.truncf %4 : vector<8x8xf32> to vector<8x8xbf16>
    %cst_7 = arith.constant dense<0.000000e+00> : vector<8x16xf32>
    %8 = tpu.matmul %7, %2, %cst_7 {dimension_numbers = #tpu.dot_dimension_numbers<[1], [0], [0], [1], [0, 0, 1, 1], [], []>} : vector<8x8xbf16>, vector<8x16xbf16>, vector<8x16xf32> -> vector<8x16xf32>
    %9 = arith.addf %6, %8 : vector<8x16xf32>
    %10 = vector.broadcast %3 : vector<1x16xf32> to vector<8x16xf32>
    %11 = arith.addf %9, %10 : vector<8x16xf32>
    %cst_8 = arith.constant 0.000000e+00 : f32
    %12 = vector.broadcast %cst_8 : f32 to vector<8x16xf32>
    %13 = arith.maximumf %11, %12 : vector<8x16xf32>
    %c0_9 = arith.constant 0 : index
    %c0_10 = arith.constant 0 : index
    %14 = vector.load %arg5[%c0_9, %c0_10] : memref<16x16xbf16, #tpu.memory_space<vmem>>, vector<16x16xbf16>
    %c0_11 = arith.constant 0 : index
    %c0_12 = arith.constant 0 : index
    %15 = vector.load %arg6[%c0_11, %c0_12] : memref<16x16xbf16, #tpu.memory_space<vmem>>, vector<16x16xbf16>
    %c0_13 = arith.constant 0 : index
    %c0_14 = arith.constant 0 : index
    %16 = vector.load %arg7[%c0_13, %c0_14] : memref<1x16xf32, #tpu.memory_space<vmem>>, vector<1x16xf32>
    %c4_i32 = arith.constant 4 : i32
    %17 = tpu.dynamic_rotate %13 by %c4_i32 dim 0 : vector<8x16xf32>, i32 -> vector<8x16xf32>
    %18 = arith.truncf %13 : vector<8x16xf32> to vector<8x16xbf16>
    %cst_15 = arith.constant dense<0.000000e+00> : vector<8x16xf32>
    %19 = tpu.matmul %18, %14, %cst_15 {dimension_numbers = #tpu.dot_dimension_numbers<[1], [0], [0], [1], [0, 0, 1, 1], [], []>} : vector<8x16xbf16>, vector<16x16xbf16>, vector<8x16xf32> -> vector<8x16xf32>
    %20 = arith.truncf %17 : vector<8x16xf32> to vector<8x16xbf16>
    %cst_16 = arith.constant dense<0.000000e+00> : vector<8x16xf32>
    %21 = tpu.matmul %20, %15, %cst_16 {dimension_numbers = #tpu.dot_dimension_numbers<[1], [0], [0], [1], [0, 0, 1, 1], [], []>} : vector<8x16xbf16>, vector<16x16xbf16>, vector<8x16xf32> -> vector<8x16xf32>
    %22 = arith.addf %19, %21 : vector<8x16xf32>
    %23 = vector.broadcast %16 : vector<1x16xf32> to vector<8x16xf32>
    %24 = arith.addf %22, %23 : vector<8x16xf32>
    %cst_17 = arith.constant 0.000000e+00 : f32
    %25 = vector.broadcast %cst_17 : f32 to vector<8x16xf32>
    %26 = arith.maximumf %24, %25 : vector<8x16xf32>
    %c0_18 = arith.constant 0 : index
    %c0_19 = arith.constant 0 : index
    %27 = vector.load %arg8[%c0_18, %c0_19] : memref<16x4xbf16, #tpu.memory_space<vmem>>, vector<16x4xbf16>
    %c0_20 = arith.constant 0 : index
    %c0_21 = arith.constant 0 : index
    %28 = vector.load %arg9[%c0_20, %c0_21] : memref<1x4xf32, #tpu.memory_space<vmem>>, vector<1x4xf32>
    %29 = vector.extract_strided_slice %26 {offsets = [0, 0], sizes = [2, 16], strides = [1, 1]} : vector<8x16xf32> to vector<2x16xf32>
    %30 = arith.truncf %29 : vector<2x16xf32> to vector<2x16xbf16>
    %cst_22 = arith.constant dense<0.000000e+00> : vector<2x4xf32>
    %31 = tpu.matmul %30, %27, %cst_22 {dimension_numbers = #tpu.dot_dimension_numbers<[1], [0], [0], [1], [0, 0, 1, 1], [], []>} : vector<2x16xbf16>, vector<16x4xbf16>, vector<2x4xf32> -> vector<2x4xf32>
    %32 = vector.broadcast %28 : vector<1x4xf32> to vector<2x4xf32>
    %33 = arith.addf %31, %32 : vector<2x4xf32>
    %c0_23 = arith.constant 0 : index
    %c0_24 = arith.constant 0 : index
    %34 = vector.load %arg10[%c0_23, %c0_24] : memref<2x4xf32, #tpu.memory_space<vmem>>, vector<2x4xf32>
    tpu.vector_store %arg10[%c0_23, %c0_24], %33 {strides = array<i32>} : memref<2x4xf32, #tpu.memory_space<vmem>>, vector<2x4xf32>,
    return
  }
  func.func @transform_0(%arg0: i32) -> (i32, i32) {
    %c0_i32 = arith.constant 0 : i32
    %c0_i32_0 = arith.constant 0 : i32
    return %arg0, %c0_i32 : i32, i32
  }
  func.func @transform_1(%arg0: i32) -> (i32, i32) {
    %c0_i32 = arith.constant 0 : i32
    %c0_i32_0 = arith.constant 0 : i32
    %c0_i32_1 = arith.constant 0 : i32
    return %c0_i32, %c0_i32_0 : i32, i32
  }
  func.func @transform_2(%arg0: i32) -> (i32, i32) {
    %c0_i32 = arith.constant 0 : i32
    %c0_i32_0 = arith.constant 0 : i32
    %c0_i32_1 = arith.constant 0 : i32
    return %c0_i32, %c0_i32_0 : i32, i32
  }
  func.func @transform_3(%arg0: i32) -> (i32, i32) {
    %c0_i32 = arith.constant 0 : i32
    %c0_i32_0 = arith.constant 0 : i32
    %c0_i32_1 = arith.constant 0 : i32
    return %c0_i32, %c0_i32_0 : i32, i32
  }
  func.func @transform_4(%arg0: i32) -> (i32, i32) {
    %c0_i32 = arith.constant 0 : i32
    %c0_i32_0 = arith.constant 0 : i32
    %c0_i32_1 = arith.constant 0 : i32
    return %c0_i32, %c0_i32_0 : i32, i32
  }
  func.func @transform_5(%arg0: i32) -> (i32, i32) {
    %c0_i32 = arith.constant 0 : i32
    %c0_i32_0 = arith.constant 0 : i32
    %c0_i32_1 = arith.constant 0 : i32
    return %c0_i32, %c0_i32_0 : i32, i32
  }
  func.func @transform_6(%arg0: i32) -> (i32, i32) {
    %c0_i32 = arith.constant 0 : i32
    %c0_i32_0 = arith.constant 0 : i32
    %c0_i32_1 = arith.constant 0 : i32
    return %c0_i32, %c0_i32_0 : i32, i32
  }
  func.func @transform_7(%arg0: i32) -> (i32, i32) {
    %c0_i32 = arith.constant 0 : i32
    %c0_i32_0 = arith.constant 0 : i32
    %c0_i32_1 = arith.constant 0 : i32
    return %c0_i32, %c0_i32_0 : i32, i32
  }
  func.func @transform_8(%arg0: i32) -> (i32, i32) {
    %c0_i32 = arith.constant 0 : i32
    %c0_i32_0 = arith.constant 0 : i32
    %c0_i32_1 = arith.constant 0 : i32
    return %c0_i32, %c0_i32_0 : i32, i32
  }
  func.func @transform_9(%arg0: i32) -> (i32, i32) {
    %c0_i32 = arith.constant 0 : i32
    %c0_i32_0 = arith.constant 0 : i32
    return %arg0, %c0_i32 : i32, i32
  }
}

</mosaic_0001>

<bundles_post_ra>
// kernel: tpu_custom_call.1
= control target key start
LH: loop header
LB: loop body
LE: loop exit
PB: predicated region body
PF: predicated region fallthrough
CT: control target
= control target key end

     0   :  { %14 = vsyncpa [#allocation3], 0  ;;  %s610_s0 = inlined_call_operand.vmem [shape: f32[8,8], index: 0, kind: input, shape index: {}]   ;;  %s611_s1 = inlined_call_operand.hbm [shape: bf16[8,16], index: 1, kind: input, shape index: {}]   ;;  %s612_s2 = inlined_call_operand.hbm [shape: bf16[8,16], index: 2, kind: input, shape index: {}]   ;;  %s613_s3 = inlined_call_operand.vmem [shape: f32[1,16], index: 3, kind: input, shape index: {}]   ;;  %s614_s4 = inlined_call_operand.vmem [shape: bf16[16,16], index: 4, kind: input, shape index: {}]   ;;  %s615_s5 = inlined_call_operand.vmem [shape: bf16[16,16], index: 5, kind: input, shape index: {}]   ;;  %s616_s6 = inlined_call_operand.vmem [shape: f32[1,16], index: 6, kind: input, shape index: {}]   ;;  %s617_s7 = inlined_call_operand.vmem [shape: bf16[16,4], index: 7, kind: input, shape index: {}]   ;;  %s618_s8 = inlined_call_operand.vmem [shape: f32[1,4], index: 8, kind: input, shape index: {}]   ;;  %s619_s9 = inlined_call_operand.hbm [shape: f32[2,4], index: 9, kind: output, shape index: {}]  }
   0x1   :  { %15 = vsyncpa [#allocation6], 0 }
   0x2   :  { %16 = vsyncpa [#allocation4], 0  ;;  %s490_s30 = smov [#allocation2]   ;;  %s491_s11 = smov [#allocation5]  }
   0x3   :  { %s25_s10 = sshll.u32 %s490_s30, 4  ;;  %s35_s12 = sshll.u32 %s491_s11, 4  ;;  %s26_s10 = int_to_ptr.vmem [resolvable:$true] %s25_s10  ;;  %s36_s12 = int_to_ptr.vmem [resolvable:$true] %s35_s12 }
   0x4   :  { %s418_s15 = scalar_lea.hbm %s611_s1, 64 }
   0x5   :  { %p419_p0 = scmp.ne.s32.totalorder %s611_s1, %s418_s15  ;;  %p422_p1 = scmp.lt.u32.totalorder %s418_s15, %s611_s1 }
   0x7   :  { %p424_p2 = pnand %p422_p1, %p419_p0 }
   0x9   :  { %427 = shalt.err (!%p424_p2)
}
   0xa   :  { %s428_s20 = scalar_lea.vmem %s26_s10, 64  ;;  %p433_p4 = scmp.lt.s32.totalorder %s26_s10, %s26_s10 }
   0xb   :  { %p429_p3 = scmp.ne.s32.totalorder %s26_s10, %s428_s20  ;;  %p434_p5 = scmp.lt.s32.totalorder %s428_s20, %s428_s20 }
   0xd   :  { %p435_p6 = por %p434_p5, %p433_p4 }
   0xf   :  { %p436_p7 = pnand %p435_p6, %p429_p3 }
  0x11   :  { %439 = shalt.err (!%p436_p7)
}
  0x12   :  { %28 = dma.hbm_to_vmem [thread:$0]  %s611_s1, 64, %s26_s10, [#allocation3]  }
  0x13   :  { %s440_s25 = scalar_lea.hbm %s612_s2, 64 }
  0x14   :  { %p441_p8 = scmp.ne.s32.totalorder %s612_s2, %s440_s25  ;;  %p444_p9 = scmp.lt.u32.totalorder %s440_s25, %s612_s2 }
  0x16   :  { %p446_p10 = pnand %p444_p9, %p441_p8 }
  0x18   :  { %449 = shalt.err (!%p446_p10)
}
  0x19   :  { %s450_s30 = scalar_lea.vmem %s36_s12, 64  ;;  %p455_p12 = scmp.lt.s32.totalorder %s36_s12, %s36_s12 }
  0x1a   :  { %p451_p11 = scmp.ne.s32.totalorder %s36_s12, %s450_s30  ;;  %p456_p13 = scmp.lt.s32.totalorder %s450_s30, %s450_s30 }
  0x1c   :  { %p457_p0 = por %p456_p13, %p455_p12 }
  0x1e   :  { %p458_p1 = pnand %p457_p0, %p451_p11 }
  0x20   :  { %461 = shalt.err (!%p458_p1)
}
  0x21   :  { %38 = dma.hbm_to_vmem [thread:$0]  %s612_s2, 64, %s36_s12, [#allocation6]  }
  0x22   :  { %484 = dma.done.wait [#allocation3], 64  }
  0x23   :  { %485 = vsyncadd [#allocation3], 4294967232 }
  0x24   :  { %486 = dma.done.wait [#allocation6], 64  }
  0x25   :  { %487 = vsyncadd [#allocation6], 4294967232  ;;  %v492_v0 = vmov 0.0   ;;  %vm493_vm0 = vmmov 0   ;;  %vm69_vm1 = vcmask 1043456   ;;  %v58_v3 = vld [vmem:[%s610_s0] sm:$0xff] }
  0x26   :  { %380 = vmatprep.subr.bf16.mxu0 %v492_v0  ;;  %386 = vmatprep.subr.bf16.mxu1 %v492_v0  ;;  %v60_v1 = vld [vmem:[#allocation5] sm:$0xf]  ;;  %v59_v2 = vld [vmem:[#allocation2] sm:$0xf]  ;;  %vm65_vm2 = vcmask 64512   ;;  %v62_v6 = vrot.slane %v58_v3, 2  ;;  %v63_v7 = vpack.c.bf16 %v58_v3, %v58_v3 }
  0x27   :  { %382 = vmatprep.mubr.msk.bf16.mxu0 %vm493_vm0, %v492_v0  ;;  %388 = vmatprep.mubr.msk.bf16.mxu1 %vm493_vm0, %v492_v0  ;;  %v71_v4 = vsel %vm69_vm1, %v60_v1, 0  ;;  %v117_v5 = vsel %vm69_vm1, %v59_v2, 0  ;;  %v416_v9 = vld [vmem:[%s614_s4] sm:$0xff]   ;;  %vm181_vm3 = vcmask 130048   ;;  %s494_s19 = smov [#allocation7]   ;;  %vm341_vm4 = vcmask 25600  }
  0x28   :  { %381 = vmatpush3.bf16.msra.mxu0 %v71_v4  ;;  %387 = vmatpush3.bf16.msra.mxu1 %v117_v5  ;;  %v64_v8 = vpack.c.bf16 %v62_v6, %v62_v6  ;;  %v415_v10 = vld [vmem:[%s615_s5] sm:$0xff]   ;;  %s349_s20 = sshll.u32 %s494_s19, 4  ;;  %s350_s20 = int_to_ptr.vmem [resolvable:$true] %s349_s20 }
  0x29   :  { %392 = vmatprep.subr.bf16.mxu0 %v492_v0  ;;  %398 = vmatprep.subr.bf16.mxu1 %v492_v0  ;;  %v361_v12 = vld [vmem:[%s613_s3] ss:$0 sm:$0xff]  ;;  %p467_p3 = scmp.lt.s32.totalorder %s350_s20, %s350_s20 }
  0x2a   :  { %v417_v26 = vld [vmem:[%s617_s7] sm:$0xff]  }
  0x2b   :  { %383 = vmatmul.mubr.msk.bf16.vlgmr.msra.gmra.mrb[0].mxu0 %vm65_vm2, %v64_v8  ;;  %389 = vmatmul.mubr.msk.bf16.vlgmr.msra.gmra.mrb[0].mxu1 %vm65_vm2, %v63_v7  ;;  %v366_v29 = vld [vmem:[%s616_s6] ss:$0 sm:$0xff]  ;;  %s462_s6 = scalar_lea.vmem %s350_s20, 32 }
  0x2c   :  { %400 = vmatprep.mubr.msk.bf16.mxu1 %vm493_vm0, %v492_v0  ;;  %394 = vmatprep.mubr.msk.bf16.mxu0 %vm493_vm0, %v492_v0  ;;  %v367_v40 = vld [vmem:[%s618_s8] ss:$0 sm:$0xff]  ;;  %p463_p2 = scmp.ne.s32.totalorder %s350_s20, %s462_s6  ;;  %p468_p4 = scmp.lt.s32.totalorder %s462_s6, %s462_s6 }
  0x2d   :  { %399 = vmatpush3.bf16.msra.mxu1 %v416_v9  ;;  %393 = vmatpush3.bf16.msra.mxu0 %v415_v10 }
  0x2e   :  { %404 = vmatprep.subr.bf16.mxu0 %v492_v0  ;;  %p469_p5 = por %p468_p4, %p467_p3 }
  0x30   :  { %p470_p6 = pnand %p469_p5, %p463_p2 }
  0xfe   :  { %v107_v11 = vpop.f32.mrb[0].mxu0  ;;  %v153_v13 = vpop.f32.mrb[0].mxu1 }
  0xff   :  { %v154_v14 = vadd.f32 %v153_v13, %v107_v11  ;;  %v384_v15 = vpop.f32.mrb[1].mxu0  ;;  %v390_v16 = vpop.f32.mrb[1].mxu1 }
 0x100   :  { %v110_v17 = vpop.f32.mrb[2].mxu0  ;;  %v156_v18 = vpop.f32.mrb[2].mxu1 }
 0x101   :  { %v165_v19 = vadd.f32 %v361_v12, %v154_v14  ;;  %v385_v20 = vpop.f32.mrb[3].mxu0  ;;  %v391_v21 = vpop.f32.mrb[3].mxu1 }
 0x103   :  { %v166_v22 = vmax.f32 %v165_v19, 0.0 }
 0x105   :  { %v172_v23 = vrot.slane %v166_v22, 4  ;;  %v173_v24 = vpack.c.bf16 %v166_v22, %v166_v22 }
 0x107   :  { %v174_v25 = vpack.c.bf16 %v172_v23, %v172_v23  ;;  %401 = vmatmul.mubr.msk.bf16.vlgmr.msra.gmra.mrb[4].mxu1 %vm181_vm3, %v173_v24 }
 0x109   :  { %395 = vmatmul.mubr.msk.bf16.vlgmr.msra.gmra.mrb[4].mxu0 %vm181_vm3, %v174_v25 }
 0x10a   :  { %406 = vmatprep.mubr.msk.bf16.mxu0 %vm493_vm0, %v492_v0  ;;  %405 = vmatpush3.bf16.msra.mxu0 %v417_v26 }
 0x1da   :  { %v268_v27 = vpop.f32.mrb[4].mxu1 }
 0x1db   :  { %v402_v28 = vpop.f32.mrb[5].mxu1 }
 0x1dc   :  { %v219_v30 = vpop.f32.mrb[4].mxu0  ;;  %v271_v31 = vpop.f32.mrb[6].mxu1 }
 0x1dd   :  { %v269_v32 = vadd.f32 %v268_v27, %v219_v30  ;;  %v396_v33 = vpop.f32.mrb[5].mxu0  ;;  %v403_v34 = vpop.f32.mrb[7].mxu1 }
 0x1de   :  { %v222_v35 = vpop.f32.mrb[6].mxu0 }
 0x1df   :  { %v280_v36 = vadd.f32 %v366_v29, %v269_v32  ;;  %v397_v37 = vpop.f32.mrb[7].mxu0 }
 0x1e1   :  { %v281_v38 = vmax.f32 %v280_v36, 0.0 }
 0x1e3   :  { %v285_v39 = vpack.c.bf16 %v281_v38, %v281_v38 }
 0x1e5   :  { %407 = vmatmul.mubr.msk.bf16.vlgmr.msra.gmra.mrb[8].mxu0 %vm181_vm3, %v285_v39 }
 0x2b8   :  { %v335_v41 = vpop.f32.mrb[8].mxu0 }
 0x2b9   :  { %v336_v42 = vadd.f32 %v367_v40, %v335_v41  ;;  %v408_v43 = vpop.f32.mrb[9].mxu0 }
 0x2ba   :  { %v338_v44 = vpop.f32.mrb[10].mxu0 }
 0x2bb   :  { %v409_v45 = vpop.f32.mrb[11].mxu0  ;;  %342 = vst.msk [vmem:[#allocation7] sm:$0x3] %vm341_vm4, %v336_v42 }
 0x2bc   :  { %473 = shalt.err (!%p470_p6)
}
 0x2bd   :  { %s474_s8 = scalar_lea.hbm %s619_s9, 32 }
 0x2be   :  { %p475_p7 = scmp.ne.s32.totalorder %s619_s9, %s474_s8  ;;  %p478_p8 = scmp.lt.u32.totalorder %s474_s8, %s619_s9 }
 0x2c0   :  { %p480_p9 = pnand %p478_p8, %p475_p7 }
 0x2c2   :  { %483 = shalt.err (!%p480_p9)
}
 0x2c3   :  { %352 = dma.vmem_to_hbm [thread:$0]  %s350_s20, 32, %s619_s9, [#allocation4]  }
 0x2c4   :  { %488 = dma.done.wait [#allocation4], 32  }
 0x2c5   :  { %489 = vsyncadd [#allocation4], 4294967264 }
 0x2c6   :  { %356 = vsyncpa [#allocation3], 1 }
 0x2c7   :  { %357 = vsyncpa [#allocation6], 1 }
 0x2c8   :  { %358 = vsyncpa [#allocation4], 1 }

</bundles_post_ra>
